<compile_context>
chip_gen: v5e
topology: v5e:2x2
jax: 0.10.0
libtpu: 0.0.40
codegen_flags: <defaults>
</compile_context>

<pallas_src>
import functools

import jax
import jax.numpy as jnp
from jax import lax
from jax.experimental import pallas as pl
from jax.experimental.pallas import tpu as pltpu


def _round_up(n, m):
    return ((n + m - 1) // m) * m


def rnn_kernel(x2d_ref, h0_ref, wih_ref, whh_ref, b_ref, wdec_ref, bdec_ref,
               probs_ref, hfin_ref, *, T, B_pad, approx_recip):
    """x2d_ref: (T*B_pad, D_pad) time-major flattened input (row t*B_pad + b == x[b, t, :]).
    All refs are sublane/lane padded in the wrapper, so every access is tile-aligned."""
    mxu_dtype = whh_ref.dtype  # f32 or bf16 (set by the wrapper)

    # Hoisted input projection: one MXU pass covering every timestep, kept as a
    # value (a few vregs at this size) -- no VMEM scratch round-trip.
    #   pre_x[t*B_pad + b, :] = x[b, t, :] @ W_ih + (b_ih + b_hh)
    pre_x = (jnp.dot(x2d_ref[...], wih_ref[...], preferred_element_type=jnp.float32)
             + b_ref[...])                                     # (T*B_pad, H_pad) f32

    # Hoisted once; same RHS operand for every unrolled step so the staged MXU
    # weights can be reused across the serial recurrence.
    whh = whh_ref[...]
    # TODO(synk): pin W_hh in the MXU explicitly via pltpu.matmul_push_rhs /
    # matmul_acc_lhs / matmul_pop once that path is validated on the target chip.

    h = h0_ref[...].astype(jnp.float32)                        # f32 carry (stays in vregs)

    # Fully-unrolled recurrence (T is small); static, (8,128)-aligned slices of pre_x.
    for t in range(T):
        px = pre_x[t * B_pad:(t + 1) * B_pad, :]               # (B_pad, H_pad) slab
        h = jnp.tanh(px + jnp.dot(h.astype(mxu_dtype), whh,
                                  preferred_element_type=jnp.float32))
    # TODO(synk): if T grows large, switch to lax.fori_loop with a bounded unroll
    # (and lax.dynamic_slice on pre_x) or a time-chunked grid instead of full unroll.

    # Decoder + softmax(dim=1) on the last hidden state.  Padded vocab lanes carry
    # a -1e30 bias (set in the wrapper) so exp() underflows to 0 there.
    logits = (jnp.dot(h.astype(mxu_dtype), wdec_ref[...],
                      preferred_element_type=jnp.float32)
              + bdec_ref[...])                                  # (B_pad, V_pad) f32
    m = jnp.max(logits, axis=-1, keepdims=True)
    e = jnp.exp(logits - m)
    denom = jnp.sum(e, axis=-1, keepdims=True)
    probs_ref[...] = e * pl.reciprocal(denom, approx=approx_recip)
    hfin_ref[...] = h


def my_rnn_forward(x, hidden, params, *, mxu_dtype=jnp.float32, approx_recip=False):
    """x: (B, T, D) float32; hidden: (1, B, H) float32.

    Returns (probabilities (B, V), hidden (1, B, H)) -- same semantics as the
    PyTorch MyRNN.forward.  mxu_dtype=bf16 + approx_recip=True is the fast path
    for v6e/v7x (matmul operands bf16, accumulation and elementwise math f32).
    """
    B, T, D = x.shape
    H = params["w_hh"].shape[0]
    V = params["w_dec"].shape[1]

    # Sublane/lane padding targets (layout plumbing only; sliced off afterwards).
    Bp = _round_up(max(B, 8), 8)
    Dp = _round_up(D, 128)
    Hp = _round_up(H, 128)
    Vp = _round_up(V, 128)
    NEG = -1e30

    # Time-major flatten + padding: row t*Bp + b holds x[b, t, :]; each timestep
    # occupies one (8,128)-aligned slab.
    x_tm = jnp.transpose(x, (1, 0, 2))                          # (T, B, D)
    x_tm = jnp.pad(x_tm, ((0, 0), (0, Bp - B), (0, Dp - D)))
    x2d = x_tm.reshape(T * Bp, Dp).astype(mxu_dtype)

    h0 = jnp.pad(hidden[0], ((0, Bp - B), (0, Hp - H)))         # (Bp, Hp) f32
    w_ih = jnp.pad(params["w_ih"], ((0, Dp - D), (0, Hp - H))).astype(mxu_dtype)
    w_hh = jnp.pad(params["w_hh"], ((0, Hp - H), (0, Hp - H))).astype(mxu_dtype)
    w_dec = jnp.pad(params["w_dec"], ((0, Hp - H), (0, Vp - V))).astype(mxu_dtype)
    b_comb = jnp.pad((params["b_ih"] + params["b_hh"]).reshape(1, H),
                     ((0, 0), (0, Hp - H)))                     # (1, Hp) f32
    # Padded vocab lanes get a very negative bias so they contribute 0 to softmax.
    b_dec = jnp.pad(params["b_dec"].reshape(1, V), ((0, 0), (0, Vp - V)),
                    constant_values=NEG)                        # (1, Vp) f32

    vmem = pl.BlockSpec(memory_space=pltpu.MemorySpace.VMEM)
    kernel = functools.partial(rnn_kernel, T=T, B_pad=Bp, approx_recip=approx_recip)

    # TODO(synk): for large T*B (esp. v7x's 64 MiB VMEM), switch to a time-chunked
    # grid / pltpu.emit_pipeline carrying h, and a parallel batch grid axis so the
    # two v7x TensorCores are both used.
    probs_p, hfin_p = pl.pallas_call(
        kernel,
        out_shape=(
            jax.ShapeDtypeStruct((Bp, Vp), jnp.float32),
            jax.ShapeDtypeStruct((Bp, Hp), jnp.float32),
        ),
        in_specs=[vmem] * 7,
        out_specs=(vmem, vmem),
    )(x2d, h0, w_ih, w_hh, b_comb, w_dec, b_dec)

    # Slice the padding off; hidden -> (1, B, H).
    return probs_p[:B, :V], hfin_p[None, :B, :H]


def init_params(key, input_size, hidden_size, vocab_size):
    """Deterministic parameter init (PyTorch-like uniform(-1/sqrt(H), 1/sqrt(H)))."""
    ks = jax.random.split(key, 6)
    bound = 1.0 / jnp.sqrt(jnp.float32(hidden_size))
    u = lambda k, shape: jax.random.uniform(k, shape, jnp.float32, -bound, bound)
    return {
        # Stored pre-transposed for right-multiplication inside the kernel.
        "w_ih": u(ks[0], (input_size, hidden_size)),            # = W_ih^T
        "w_hh": u(ks[1], (hidden_size, hidden_size)),           # = W_hh^T
        "b_ih": u(ks[2], (hidden_size,)),
        "b_hh": u(ks[3], (hidden_size,)),
        "w_dec": u(ks[4], (hidden_size, vocab_size)),           # = W_dec^T
        "b_dec": u(ks[5], (vocab_size,)),
    }


def reference_forward(x, hidden, params):
    """Pure-JAX reference matching nn.RNN(tanh) + Linear + softmax."""
    h = hidden[0]
    b = params["b_ih"] + params["b_hh"]
    for t in range(x.shape[1]):
        h = jnp.tanh(x[:, t, :] @ params["w_ih"] + h @ params["w_hh"] + b)
    logits = h @ params["w_dec"] + params["b_dec"]
    return jax.nn.softmax(logits, axis=1), h[None]


if __name__ == "__main__":
    vocab = ['I', 'love', 'recurrent', 'neural']
    vocab_size = len(vocab)          # 4
    input_size = 16
    hidden_size = 32
    num_layers = 1
    B, T = 2, 8

    key = jax.random.PRNGKey(0)
    k_p, k_x, k_h = jax.random.split(key, 3)
    params = init_params(k_p, input_size, hidden_size, vocab_size)
    x = jax.random.normal(k_x, (B, T, input_size), jnp.float32)
    hidden = jax.random.normal(k_h, (num_layers, B, hidden_size), jnp.float32)

    probs_ref, h_ref = reference_forward(x, hidden, params)

    # --- f32 path (exact reciprocal): strict parity with the reference. ---
    probs, h_out = my_rnn_forward(x, hidden, params)
    probs = jax.block_until_ready(probs)
    h_out = jax.block_until_ready(h_out)
    assert probs.shape == (B, vocab_size)
    assert h_out.shape == (num_layers, B, hidden_size)
    assert jnp.allclose(probs, probs_ref, atol=1e-5, rtol=1e-5)
    assert jnp.allclose(h_out, h_ref, atol=1e-5, rtol=1e-5)
    assert jnp.allclose(jnp.sum(probs, axis=1), 1.0, atol=1e-5)

    # --- bf16-MXU / approx-reciprocal fast path (v6e/v7x): relaxed tolerances. ---
    probs_fast, h_fast = my_rnn_forward(x, hidden, params,
                                        mxu_dtype=jnp.bfloat16, approx_recip=True)
    probs_fast = jax.block_until_ready(probs_fast)
    h_fast = jax.block_until_ready(h_fast)
    assert probs_fast.shape == (B, vocab_size)
    assert h_fast.shape == (num_layers, B, hidden_size)
    assert jnp.allclose(probs_fast, probs_ref, atol=5e-2, rtol=5e-2)
    assert jnp.allclose(h_fast, h_ref, atol=5e-2, rtol=5e-2)
    assert jnp.allclose(jnp.sum(probs_fast, axis=1), 1.0, atol=1e-2)

    print("KERNEL_OK")
</pallas_src>

<mosaic_0001>
module attributes {stable_mosaic.version = 11 : i64} {
  func.func @rnn_kernel(%arg0: memref<64x128xf32, #tpu.memory_space<vmem>>, %arg1: memref<8x128xf32, #tpu.memory_space<vmem>>, %arg2: memref<128x128xf32, #tpu.memory_space<vmem>>, %arg3: memref<128x128xf32, #tpu.memory_space<vmem>>, %arg4: memref<1x128xf32, #tpu.memory_space<vmem>>, %arg5: memref<128x128xf32, #tpu.memory_space<vmem>>, %arg6: memref<1x128xf32, #tpu.memory_space<vmem>>, %arg7: memref<8x128xf32, #tpu.memory_space<vmem>>, %arg8: memref<8x128xf32, #tpu.memory_space<vmem>>) attributes {dimension_semantics = [], scalar_prefetch = 0 : i64, scratch_operands = 0 : i64, tpu.core_type = #tpu.core_type<tc>} {
    %c0 = arith.constant 0 : index
    %c0_0 = arith.constant 0 : index
    %0 = vector.load %arg0[%c0, %c0_0] : memref<64x128xf32, #tpu.memory_space<vmem>>, vector<64x128xf32>
    %c0_1 = arith.constant 0 : index
    %c0_2 = arith.constant 0 : index
    %1 = vector.load %arg2[%c0_1, %c0_2] : memref<128x128xf32, #tpu.memory_space<vmem>>, vector<128x128xf32>
    %cst = arith.constant dense<0.000000e+00> : vector<64x128xf32>
    %2 = tpu.matmul %0, %1, %cst {dimension_numbers = #tpu.dot_dimension_numbers<[1], [0], [0], [1], [0, 0, 1, 1], [], []>} : vector<64x128xf32>, vector<128x128xf32>, vector<64x128xf32> -> vector<64x128xf32>
    %c0_3 = arith.constant 0 : index
    %c0_4 = arith.constant 0 : index
    %3 = vector.load %arg4[%c0_3, %c0_4] : memref<1x128xf32, #tpu.memory_space<vmem>>, vector<1x128xf32>
    %4 = vector.broadcast %3 : vector<1x128xf32> to vector<64x128xf32>
    %5 = arith.addf %2, %4 : vector<64x128xf32>
    %c0_5 = arith.constant 0 : index
    %c0_6 = arith.constant 0 : index
    %6 = vector.load %arg3[%c0_5, %c0_6] : memref<128x128xf32, #tpu.memory_space<vmem>>, vector<128x128xf32>
    %c0_7 = arith.constant 0 : index
    %c0_8 = arith.constant 0 : index
    %7 = vector.load %arg1[%c0_7, %c0_8] : memref<8x128xf32, #tpu.memory_space<vmem>>, vector<8x128xf32>
    %8 = vector.extract_strided_slice %5 {offsets = [0, 0], sizes = [8, 128], strides = [1, 1]} : vector<64x128xf32> to vector<8x128xf32>
    %cst_9 = arith.constant dense<0.000000e+00> : vector<8x128xf32>
    %9 = tpu.matmul %7, %6, %cst_9 {dimension_numbers = #tpu.dot_dimension_numbers<[1], [0], [0], [1], [0, 0, 1, 1], [], []>} : vector<8x128xf32>, vector<128x128xf32>, vector<8x128xf32> -> vector<8x128xf32>
    %10 = arith.addf %8, %9 : vector<8x128xf32>
    %11 = math.tanh %10 : vector<8x128xf32>
    %12 = vector.extract_strided_slice %5 {offsets = [8, 0], sizes = [8, 128], strides = [1, 1]} : vector<64x128xf32> to vector<8x128xf32>
    %cst_10 = arith.constant dense<0.000000e+00> : vector<8x128xf32>
    %13 = tpu.matmul %11, %6, %cst_10 {dimension_numbers = #tpu.dot_dimension_numbers<[1], [0], [0], [1], [0, 0, 1, 1], [], []>} : vector<8x128xf32>, vector<128x128xf32>, vector<8x128xf32> -> vector<8x128xf32>
    %14 = arith.addf %12, %13 : vector<8x128xf32>
    %15 = math.tanh %14 : vector<8x128xf32>
    %16 = vector.extract_strided_slice %5 {offsets = [16, 0], sizes = [8, 128], strides = [1, 1]} : vector<64x128xf32> to vector<8x128xf32>
    %cst_11 = arith.constant dense<0.000000e+00> : vector<8x128xf32>
    %17 = tpu.matmul %15, %6, %cst_11 {dimension_numbers = #tpu.dot_dimension_numbers<[1], [0], [0], [1], [0, 0, 1, 1], [], []>} : vector<8x128xf32>, vector<128x128xf32>, vector<8x128xf32> -> vector<8x128xf32>
    %18 = arith.addf %16, %17 : vector<8x128xf32>
    %19 = math.tanh %18 : vector<8x128xf32>
    %20 = vector.extract_strided_slice %5 {offsets = [24, 0], sizes = [8, 128], strides = [1, 1]} : vector<64x128xf32> to vector<8x128xf32>
    %cst_12 = arith.constant dense<0.000000e+00> : vector<8x128xf32>
    %21 = tpu.matmul %19, %6, %cst_12 {dimension_numbers = #tpu.dot_dimension_numbers<[1], [0], [0], [1], [0, 0, 1, 1], [], []>} : vector<8x128xf32>, vector<128x128xf32>, vector<8x128xf32> -> vector<8x128xf32>
    %22 = arith.addf %20, %21 : vector<8x128xf32>
    %23 = math.tanh %22 : vector<8x128xf32>
    %24 = vector.extract_strided_slice %5 {offsets = [32, 0], sizes = [8, 128], strides = [1, 1]} : vector<64x128xf32> to vector<8x128xf32>
    %cst_13 = arith.constant dense<0.000000e+00> : vector<8x128xf32>
    %25 = tpu.matmul %23, %6, %cst_13 {dimension_numbers = #tpu.dot_dimension_numbers<[1], [0], [0], [1], [0, 0, 1, 1], [], []>} : vector<8x128xf32>, vector<128x128xf32>, vector<8x128xf32> -> vector<8x128xf32>
    %26 = arith.addf %24, %25 : vector<8x128xf32>
    %27 = math.tanh %26 : vector<8x128xf32>
    %28 = vector.extract_strided_slice %5 {offsets = [40, 0], sizes = [8, 128], strides = [1, 1]} : vector<64x128xf32> to vector<8x128xf32>
    %cst_14 = arith.constant dense<0.000000e+00> : vector<8x128xf32>
    %29 = tpu.matmul %27, %6, %cst_14 {dimension_numbers = #tpu.dot_dimension_numbers<[1], [0], [0], [1], [0, 0, 1, 1], [], []>} : vector<8x128xf32>, vector<128x128xf32>, vector<8x128xf32> -> vector<8x128xf32>
    %30 = arith.addf %28, %29 : vector<8x128xf32>
    %31 = math.tanh %30 : vector<8x128xf32>
    %32 = vector.extract_strided_slice %5 {offsets = [48, 0], sizes = [8, 128], strides = [1, 1]} : vector<64x128xf32> to vector<8x128xf32>
    %cst_15 = arith.constant dense<0.000000e+00> : vector<8x128xf32>
    %33 = tpu.matmul %31, %6, %cst_15 {dimension_numbers = #tpu.dot_dimension_numbers<[1], [0], [0], [1], [0, 0, 1, 1], [], []>} : vector<8x128xf32>, vector<128x128xf32>, vector<8x128xf32> -> vector<8x128xf32>
    %34 = arith.addf %32, %33 : vector<8x128xf32>
    %35 = math.tanh %34 : vector<8x128xf32>
    %36 = vector.extract_strided_slice %5 {offsets = [56, 0], sizes = [8, 128], strides = [1, 1]} : vector<64x128xf32> to vector<8x128xf32>
    %cst_16 = arith.constant dense<0.000000e+00> : vector<8x128xf32>
    %37 = tpu.matmul %35, %6, %cst_16 {dimension_numbers = #tpu.dot_dimension_numbers<[1], [0], [0], [1], [0, 0, 1, 1], [], []>} : vector<8x128xf32>, vector<128x128xf32>, vector<8x128xf32> -> vector<8x128xf32>
    %38 = arith.addf %36, %37 : vector<8x128xf32>
    %39 = math.tanh %38 : vector<8x128xf32>
    %c0_17 = arith.constant 0 : index
    %c0_18 = arith.constant 0 : index
    %40 = vector.load %arg5[%c0_17, %c0_18] : memref<128x128xf32, #tpu.memory_space<vmem>>, vector<128x128xf32>
    %cst_19 = arith.constant dense<0.000000e+00> : vector<8x128xf32>
    %41 = tpu.matmul %39, %40, %cst_19 {dimension_numbers = #tpu.dot_dimension_numbers<[1], [0], [0], [1], [0, 0, 1, 1], [], []>} : vector<8x128xf32>, vector<128x128xf32>, vector<8x128xf32> -> vector<8x128xf32>
    %c0_20 = arith.constant 0 : index
    %c0_21 = arith.constant 0 : index
    %42 = vector.load %arg6[%c0_20, %c0_21] : memref<1x128xf32, #tpu.memory_space<vmem>>, vector<1x128xf32>
    %43 = vector.broadcast %42 : vector<1x128xf32> to vector<8x128xf32>
    %44 = arith.addf %41, %43 : vector<8x128xf32>
    %cst_22 = arith.constant dense<0xFF800000> : vector<8xf32>
    %45 = vector.multi_reduction <maximumf>, %44, %cst_22 [1] : vector<8x128xf32> to vector<8xf32>
    %46 = vector.shape_cast %45 : vector<8xf32> to vector<8x1xf32>
    %47 = vector.broadcast %46 : vector<8x1xf32> to vector<8x128xf32>
    %48 = arith.subf %44, %47 : vector<8x128xf32>
    %49 = math.exp %48 : vector<8x128xf32>
    %cst_23 = arith.constant dense<0.000000e+00> : vector<8xf32>
    %50 = vector.multi_reduction <add>, %49, %cst_23 [1] : vector<8x128xf32> to vector<8xf32>
    %51 = vector.shape_cast %50 : vector<8xf32> to vector<8x1xf32>
    %52 = tpu.reciprocal %51 : vector<8x1xf32> -> vector<8x1xf32>
    %53 = vector.broadcast %52 : vector<8x1xf32> to vector<8x128xf32>
    %54 = arith.mulf %49, %53 : vector<8x128xf32>
    %c0_24 = arith.constant 0 : index
    %c0_25 = arith.constant 0 : index
    %55 = vector.load %arg7[%c0_24, %c0_25] : memref<8x128xf32, #tpu.memory_space<vmem>>, vector<8x128xf32>
    tpu.vector_store %arg7[%c0_24, %c0_25], %54 {strides = array<i32>} : memref<8x128xf32, #tpu.memory_space<vmem>>, vector<8x128xf32>,
    %c0_26 = arith.constant 0 : index
    %c0_27 = arith.constant 0 : index
    %56 = vector.load %arg8[%c0_26, %c0_27] : memref<8x128xf32, #tpu.memory_space<vmem>>, vector<8x128xf32>
    tpu.vector_store %arg8[%c0_26, %c0_27], %39 {strides = array<i32>} : memref<8x128xf32, #tpu.memory_space<vmem>>, vector<8x128xf32>,
    return
  }
}

</mosaic_0001>

<bundles_post_ra>
// kernel: tpu_custom_call.1
= control target key start
LH: loop header
LB: loop body
LE: loop exit
PB: predicated region body
PF: predicated region fallthrough
CT: control target
= control target key end

     0   :  { %14 = vsyncpa [#allocation3], 0  ;;  %s927_s0 = inlined_call_operand.hbm [shape: f32[64,128], index: 0, kind: input, shape index: {}]   ;;  %s928_s1 = inlined_call_operand.hbm [shape: f32[8,128], index: 1, kind: input, shape index: {}]   ;;  %s929_s2 = inlined_call_operand.hbm [shape: f32[128,128], index: 2, kind: input, shape index: {}]   ;;  %s930_s3 = inlined_call_operand.hbm [shape: f32[128,128], index: 3, kind: input, shape index: {}]   ;;  %s931_s4 = inlined_call_operand.vmem [shape: f32[1,128], index: 4, kind: input, shape index: {}]   ;;  %s932_s5 = inlined_call_operand.hbm [shape: f32[128,128], index: 5, kind: input, shape index: {}]   ;;  %s933_s6 = inlined_call_operand.vmem [shape: f32[1,128], index: 6, kind: input, shape index: {}]   ;;  %s934_s7 = inlined_call_operand.hbm [shape: f32[8,128], index: 7, kind: output, shape index: {0}]   ;;  %s935_s8 = inlined_call_operand.hbm [shape: f32[8,128], index: 8, kind: output, shape index: {1}]  }
   0x1   :  { %15 = vsyncpa [#allocation6], 0 }
   0x2   :  { %16 = vsyncpa [#allocation9], 0 }
   0x3   :  { %17 = vsyncpa [#allocation4], 0  ;;  %s37_s29 = sshll.u32 %s928_s1, 4  ;;  %s38_s29 = int_to_ptr.hbm [resolvable:$true] %s37_s29 }
   0x4   :  { %18 = vsyncpa [#allocation13], 0  ;;  %s676_s30 = smov [#allocation5]   ;;  %s60_s12 = sshll.u32 %s930_s3, 4  ;;  %s61_s12 = int_to_ptr.hbm [resolvable:$true] %s60_s12 }
   0x5   :  { %s39_s9 = sshll.u32 %s676_s30, 4  ;;  %s677_s13 = smov [#allocation8]   ;;  %s40_s9 = int_to_ptr.vmem [resolvable:$true] %s39_s9 }
   0x6   :  { %42 = dma.hbm_to_vmem [thread:$0]  %s38_s29, 128, %s40_s9, [#allocation6]  }
   0x7   :  { %s62_s14 = sshll.u32 %s677_s13, 4  ;;  %s23_s17 = sshll.u32 %s927_s0, 4  ;;  %s63_s14 = int_to_ptr.vmem [resolvable:$true] %s62_s14  ;;  %s24_s17 = int_to_ptr.hbm [resolvable:$true] %s23_s17 }
   0x8   :  { %s678_s1 = smov 128   ;;  %s679_s18 = smov 8  }
   0x9   :  { %68 = dma.hbm_to_vmem [thread:$0]  %s61_s12, 2048, %s63_s14, [#allocation9], %s678_s1, %s678_s1, %s679_s18  }
   0xa   :  { %s47_s21 = sshll.u32 %s929_s2, 4  ;;  %s680_s22 = smov [#allocation2]   ;;  %s48_s21 = int_to_ptr.hbm [resolvable:$true] %s47_s21 }
   0xb   :  { %s25_s23 = sshll.u32 %s680_s22, 4  ;;  %s681_s3 = smov [#allocation7]   ;;  %s26_s23 = int_to_ptr.vmem [resolvable:$true] %s25_s23 }
   0xc   :  { %31 = dma.hbm_to_vmem [thread:$0]  %s24_s17, 1024, %s26_s23, [#allocation3], %s678_s1, %s678_s1, %s679_s18  }
   0xd   :  { %s49_s24 = sshll.u32 %s681_s3, 4  ;;  %s75_s0 = sshll.u32 %s932_s5, 4  ;;  %s50_s24 = int_to_ptr.vmem [resolvable:$true] %s49_s24  ;;  %s76_s0 = int_to_ptr.hbm [resolvable:$true] %s75_s0 }
   0xe   :  { %55 = dma.hbm_to_vmem [thread:$0]  %s48_s21, 2048, %s50_s24, [#allocation6], %s678_s1, %s678_s1, %s679_s18  }
   0xf   :  { %s682_s27 = smov [#allocation10]  }
  0x10   :  { %s77_s28 = sshll.u32 %s682_s27, 4  ;;  %s78_s28 = int_to_ptr.vmem [resolvable:$true] %s77_s28 }
  0x11   :  { %83 = dma.hbm_to_vmem [thread:$0]  %s76_s0, 2048, %s78_s28, [#allocation9], %s678_s1, %s678_s1, %s679_s18  }
  0x12   :  { %666 = dma.done.wait [#allocation3], 1024  }
  0x13   :  { %667 = vsyncadd [#allocation3], 4294966272 }
  0x14   :  { %668 = dma.done.wait [#allocation6], 2176  }
  0x15   :  { %669 = vsyncadd [#allocation6], 4294965120 }
  0x16   :  { %670 = dma.done.wait [#allocation9], 4096  }
  0x17   :  { %671 = vsyncadd [#allocation9], 4294963200  ;;  %v129_v0 = vld [vmem:[#allocation7 + $0x78] sm:$0xff]  ;;  %v128_v1 = vld [vmem:[#allocation7 + $0x70] sm:$0xff]  ;;  %s683_s30 = smov [#allocation12]   ;;  %s450_s12 = sshll.u32 %s935_s8, 4  ;;  %s451_s12 = int_to_ptr.hbm [resolvable:$true] %s450_s12 }
  0x18   :  { %v745_v2 = vld [vmem:[#allocation8 + $0x78] sm:$0xff]  ;;  %134 = vmatpush.msra.mxu0 %v129_v0  ;;  %v748_v3 = vld [vmem:[#allocation8 + $0x70] sm:$0xff]  ;;  %v127_v4 = vld [vmem:[#allocation7 + $0x68] sm:$0xff]  ;;  %s448_s9 = sshll.u32 %s683_s30, 4  ;;  %s439_s15 = sshll.u32 %s934_s7, 4  ;;  %s449_s9 = int_to_ptr.vmem [resolvable:$true] %s448_s9  ;;  %s440_s15 = int_to_ptr.hbm [resolvable:$true] %s439_s15 }
  0x19   :  { %192 = vmatpush.msra.mxu1 %v745_v2  ;;  %v750_v5 = vld [vmem:[#allocation8 + $0x68] sm:$0xff]  ;;  %214 = vmatpush.msra.mxu2 %v745_v2  ;;  %v126_v6 = vld [vmem:[#allocation7 + $0x60] sm:$0xff]  ;;  %v125_v8 = vld [vmem:[#allocation7 + $0x58] sm:$0xff] }
  0x1a   :  { %236 = vmatpush.msra.mxu3 %v745_v2  ;;  %135 = vmatpush.msra.mxu0 %v128_v1  ;;  %v755_v7 = vld [vmem:[#allocation8 + $0x60] sm:$0xff]  ;;  %v760_v9 = vld [vmem:[#allocation8 + $0x58] sm:$0xff]  ;;  %v124_v10 = vld [vmem:[#allocation7 + $0x50] sm:$0xff] }
  0x1b   :  { %193 = vmatpush.msra.mxu1 %v748_v3  ;;  %215 = vmatpush.msra.mxu2 %v748_v3  ;;  %v765_v11 = vld [vmem:[#allocation8 + $0x50] sm:$0xff]  ;;  %v123_v12 = vld [vmem:[#allocation7 + $0x48] sm:$0xff]  ;;  %v122_v14 = vld [vmem:[#allocation7 + $0x40] sm:$0xff] }
  0x1c   :  { %237 = vmatpush.msra.mxu3 %v748_v3  ;;  %136 = vmatpush.msra.mxu0 %v127_v4  ;;  %v770_v13 = vld [vmem:[#allocation8 + $0x48] sm:$0xff]  ;;  %v775_v15 = vld [vmem:[#allocation8 + $0x40] sm:$0xff]  ;;  %v121_v16 = vld [vmem:[#allocation7 + $0x38] sm:$0xff] }
  0x1d   :  { %194 = vmatpush.msra.mxu1 %v750_v5  ;;  %216 = vmatpush.msra.mxu2 %v750_v5  ;;  %v780_v17 = vld [vmem:[#allocation8 + $0x38] sm:$0xff]  ;;  %v120_v18 = vld [vmem:[#allocation7 + $0x30] sm:$0xff]  ;;  %v119_v20 = vld [vmem:[#allocation7 + $0x28] sm:$0xff] }
  0x1e   :  { %238 = vmatpush.msra.mxu3 %v750_v5  ;;  %137 = vmatpush.msra.mxu0 %v126_v6  ;;  %v785_v19 = vld [vmem:[#allocation8 + $0x30] sm:$0xff]  ;;  %v790_v21 = vld [vmem:[#allocation8 + $0x28] sm:$0xff]  ;;  %v118_v22 = vld [vmem:[#allocation7 + $0x20] sm:$0xff] }
  0x1f   :  { %195 = vmatpush.msra.mxu1 %v755_v7  ;;  %217 = vmatpush.msra.mxu2 %v755_v7  ;;  %v795_v23 = vld [vmem:[#allocation8 + $0x20] sm:$0xff]  ;;  %v117_v24 = vld [vmem:[#allocation7 + $0x18] sm:$0xff]  ;;  %v116_v26 = vld [vmem:[#allocation7 + $0x10] sm:$0xff] }
  0x20   :  { %239 = vmatpush.msra.mxu3 %v755_v7  ;;  %138 = vmatpush.msra.mxu0 %v125_v8  ;;  %v800_v25 = vld [vmem:[#allocation8 + $0x18] sm:$0xff]  ;;  %v805_v27 = vld [vmem:[#allocation8 + $0x10] sm:$0xff]  ;;  %v115_v28 = vld [vmem:[#allocation7 + $0x8] sm:$0xff] }
  0x21   :  { %196 = vmatpush.msra.mxu1 %v760_v9  ;;  %218 = vmatpush.msra.mxu2 %v760_v9  ;;  %v810_v29 = vld [vmem:[#allocation8 + $0x8] sm:$0xff]  ;;  %v114_v30 = vld [vmem:[#allocation7] sm:$0xff]  ;;  %v106_v32 = vld [vmem:[#allocation2] sm:$0xff] }
  0x22   :  { %240 = vmatpush.msra.mxu3 %v760_v9  ;;  %139 = vmatpush.msra.mxu0 %v124_v10  ;;  %v815_v31 = vld [vmem:[#allocation8] sm:$0xff]  ;;  %v191_v33 = vld [vmem:[#allocation5] sm:$0xff]  ;;  %v108_v41 = vld [vmem:[#allocation2 + $0x10] sm:$0xff] }
  0x23   :  { %197 = vmatpush.msra.mxu1 %v765_v11  ;;  %219 = vmatpush.msra.mxu2 %v765_v11  ;;  %v107_v34 = vld [vmem:[#allocation2 + $0x8] sm:$0xff]  ;;  %v908_v35 = vld [vmem:[%s931_s4] ss:$0 sm:$0xff]  ;;  %v109_v47 = vld [vmem:[#allocation2 + $0x18] sm:$0xff] }
  0x24   :  { %241 = vmatpush.msra.mxu3 %v765_v11  ;;  %140 = vmatpush.msra.mxu0 %v123_v12  ;;  %v110_v53 = vld [vmem:[#allocation2 + $0x20] sm:$0xff]  ;;  %v111_v59 = vld [vmem:[#allocation2 + $0x28] sm:$0xff]  ;;  %v112_v60 = vld [vmem:[#allocation2 + $0x30] sm:$0xff] }
  0x25   :  { %198 = vmatpush.msra.mxu1 %v770_v13  ;;  %220 = vmatpush.msra.mxu2 %v770_v13  ;;  %v383_v8 = vld [vmem:[#allocation10 + $0x78] sm:$0xff]  ;;  %v380_v12 = vld [vmem:[#allocation10 + $0x60] sm:$0xff] }
  0x26   :  { %242 = vmatpush.msra.mxu3 %v770_v13  ;;  %141 = vmatpush.msra.mxu0 %v122_v14  ;;  %v378_v14 = vld [vmem:[#allocation10 + $0x50] sm:$0xff] }
  0x27   :  { %199 = vmatpush.msra.mxu1 %v775_v15  ;;  %221 = vmatpush.msra.mxu2 %v775_v15 }
  0x28   :  { %243 = vmatpush.msra.mxu3 %v775_v15  ;;  %142 = vmatpush.msra.mxu0 %v121_v16 }
  0x29   :  { %200 = vmatpush.msra.mxu1 %v780_v17  ;;  %222 = vmatpush.msra.mxu2 %v780_v17 }
  0x2a   :  { %244 = vmatpush.msra.mxu3 %v780_v17  ;;  %143 = vmatpush.msra.mxu0 %v120_v18  ;;  %v375_v18 = vld [vmem:[#allocation10 + $0x38] sm:$0xff] }
  0x2b   :  { %201 = vmatpush.msra.mxu1 %v785_v19  ;;  %223 = vmatpush.msra.mxu2 %v785_v19 }
  0x2c   :  { %245 = vmatpush.msra.mxu3 %v785_v19  ;;  %144 = vmatpush.msra.mxu0 %v119_v20  ;;  %v373_v20 = vld [vmem:[#allocation10 + $0x28] sm:$0xff] }
  0x2d   :  { %202 = vmatpush.msra.mxu1 %v790_v21  ;;  %224 = vmatpush.msra.mxu2 %v790_v21 }
  0x2e   :  { %246 = vmatpush.msra.mxu3 %v790_v21  ;;  %145 = vmatpush.msra.mxu0 %v118_v22 }
  0x2f   :  { %203 = vmatpush.msra.mxu1 %v795_v23  ;;  %225 = vmatpush.msra.mxu2 %v795_v23 }
  0x30   :  { %247 = vmatpush.msra.mxu3 %v795_v23  ;;  %146 = vmatpush.msra.mxu0 %v117_v24 }
  0x31   :  { %204 = vmatpush.msra.mxu1 %v800_v25  ;;  %226 = vmatpush.msra.mxu2 %v800_v25 }
  0x32   :  { %248 = vmatpush.msra.mxu3 %v800_v25  ;;  %147 = vmatpush.msra.mxu0 %v116_v26  ;;  %v371_v26 = vld [vmem:[#allocation10 + $0x18] sm:$0xff] }
  0x33   :  { %205 = vmatpush.msra.mxu1 %v805_v27  ;;  %227 = vmatpush.msra.mxu2 %v805_v27 }
  0x34   :  { %249 = vmatpush.msra.mxu3 %v805_v27  ;;  %148 = vmatpush.msra.mxu0 %v115_v28  ;;  %v369_v28 = vld [vmem:[#allocation10 + $0x8] sm:$0xff] }
  0x35   :  { %206 = vmatpush.msra.mxu1 %v810_v29  ;;  %228 = vmatpush.msra.mxu2 %v810_v29 }
  0x36   :  { %250 = vmatpush.msra.mxu3 %v810_v29  ;;  %149 = vmatpush.msra.mxu0 %v114_v30 }
  0x37   :  { %207 = vmatpush.msra.mxu1 %v815_v31  ;;  %150 = vmatmul.f32.vlgmr.msra.gmra.mxu0 %v106_v32 }
  0x38   :  { %208 = vmatmul.f32.vlgmr.msra.gmra.mxu1 %v191_v33  ;;  %229 = vmatpush.msra.mxu2 %v815_v31 }
  0x39   :  { %251 = vmatpush.msra.mxu3 %v815_v31  ;;  %258 = vmatpush.msrb.mxu1 %v745_v2 }
  0x3a   :  { %280 = vmatpush.msrb.mxu2 %v745_v2  ;;  %324 = vmatpush.msrb.mxu0 %v745_v2 }
  0x3b   :  { %302 = vmatpush.msrb.mxu3 %v745_v2  ;;  %259 = vmatpush.msrb.mxu1 %v748_v3 }
  0x3c   :  { %281 = vmatpush.msrb.mxu2 %v748_v3  ;;  %325 = vmatpush.msrb.mxu0 %v748_v3 }
  0x3d   :  { %303 = vmatpush.msrb.mxu3 %v748_v3  ;;  %260 = vmatpush.msrb.mxu1 %v750_v5 }
  0x3e   :  { %282 = vmatpush.msrb.mxu2 %v750_v5  ;;  %326 = vmatpush.msrb.mxu0 %v750_v5 }
  0x3f   :  { %304 = vmatpush.msrb.mxu3 %v750_v5  ;;  %261 = vmatpush.msrb.mxu1 %v755_v7 }
  0x40   :  { %283 = vmatpush.msrb.mxu2 %v755_v7  ;;  %327 = vmatpush.msrb.mxu0 %v755_v7 }
  0x41   :  { %305 = vmatpush.msrb.mxu3 %v755_v7  ;;  %262 = vmatpush.msrb.mxu1 %v760_v9 }
  0x42   :  { %284 = vmatpush.msrb.mxu2 %v760_v9  ;;  %328 = vmatpush.msrb.mxu0 %v760_v9 }
  0x43   :  { %306 = vmatpush.msrb.mxu3 %v760_v9  ;;  %263 = vmatpush.msrb.mxu1 %v765_v11 }
  0x44   :  { %285 = vmatpush.msrb.mxu2 %v765_v11  ;;  %329 = vmatpush.msrb.mxu0 %v765_v11 }
  0x45   :  { %307 = vmatpush.msrb.mxu3 %v765_v11  ;;  %264 = vmatpush.msrb.mxu1 %v770_v13 }
  0x46   :  { %286 = vmatpush.msrb.mxu2 %v770_v13  ;;  %330 = vmatpush.msrb.mxu0 %v770_v13 }
  0x47   :  { %308 = vmatpush.msrb.mxu3 %v770_v13  ;;  %265 = vmatpush.msrb.mxu1 %v775_v15 }
  0x48   :  { %287 = vmatpush.msrb.mxu2 %v775_v15  ;;  %331 = vmatpush.msrb.mxu0 %v775_v15 }
  0x49   :  { %309 = vmatpush.msrb.mxu3 %v775_v15  ;;  %266 = vmatpush.msrb.mxu1 %v780_v17 }
  0x4a   :  { %288 = vmatpush.msrb.mxu2 %v780_v17  ;;  %332 = vmatpush.msrb.mxu0 %v780_v17 }
  0x4b   :  { %310 = vmatpush.msrb.mxu3 %v780_v17  ;;  %267 = vmatpush.msrb.mxu1 %v785_v19 }
  0x4c   :  { %289 = vmatpush.msrb.mxu2 %v785_v19  ;;  %333 = vmatpush.msrb.mxu0 %v785_v19 }
  0x4d   :  { %311 = vmatpush.msrb.mxu3 %v785_v19  ;;  %268 = vmatpush.msrb.mxu1 %v790_v21 }
  0x4e   :  { %290 = vmatpush.msrb.mxu2 %v790_v21  ;;  %334 = vmatpush.msrb.mxu0 %v790_v21 }
  0x4f   :  { %312 = vmatpush.msrb.mxu3 %v790_v21  ;;  %269 = vmatpush.msrb.mxu1 %v795_v23 }
  0x50   :  { %291 = vmatpush.msrb.mxu2 %v795_v23  ;;  %335 = vmatpush.msrb.mxu0 %v795_v23 }
  0x51   :  { %313 = vmatpush.msrb.mxu3 %v795_v23  ;;  %270 = vmatpush.msrb.mxu1 %v800_v25 }
  0x52   :  { %292 = vmatpush.msrb.mxu2 %v800_v25  ;;  %336 = vmatpush.msrb.mxu0 %v800_v25 }
  0x53   :  { %314 = vmatpush.msrb.mxu3 %v800_v25  ;;  %271 = vmatpush.msrb.mxu1 %v805_v27 }
  0x54   :  { %293 = vmatpush.msrb.mxu2 %v805_v27  ;;  %337 = vmatpush.msrb.mxu0 %v805_v27 }
  0x55   :  { %315 = vmatpush.msrb.mxu3 %v805_v27  ;;  %272 = vmatpush.msrb.mxu1 %v810_v29 }
  0x56   :  { %294 = vmatpush.msrb.mxu2 %v810_v29  ;;  %338 = vmatpush.msrb.mxu0 %v810_v29 }
  0x57   :  { %316 = vmatpush.msrb.mxu3 %v810_v29  ;;  %273 = vmatpush.msrb.mxu1 %v815_v31 }
  0x58   :  { %295 = vmatpush.msrb.mxu2 %v815_v31  ;;  %339 = vmatpush.msrb.mxu0 %v815_v31 }
  0x59   :  { %317 = vmatpush.msrb.mxu3 %v815_v31  ;;  %346 = vmatpush.msra.mxu1 %v745_v2  ;;  %v113_v2 = vld [vmem:[#allocation2 + $0x38] sm:$0xff] }
  0x5a   :  { %153 = vmatmul.f32.gmra.mxu0 %v107_v34  ;;  %v477_v34 = vld [vmem:[%s933_s6] ss:$0 sm:$0xff]  ;;  %s684_s6 = smov [#allocation11]  }
  0x5b   :  { %347 = vmatpush.msra.mxu1 %v748_v3  ;;  %s437_s13 = sshll.u32 %s684_s6, 4  ;;  %s438_s13 = int_to_ptr.vmem [resolvable:$true] %s437_s13 }
  0x5d   :  { %348 = vmatpush.msra.mxu1 %v750_v5 }
  0x5f   :  { %349 = vmatpush.msra.mxu1 %v755_v7 }
  0x61   :  { %350 = vmatpush.msra.mxu1 %v760_v9  ;;  %v382_v9 = vld [vmem:[#allocation10 + $0x70] sm:$0xff] }
  0x62   :  { %156 = vmatmul.f32.gmra.mxu0 %v108_v41 }
  0x63   :  { %351 = vmatpush.msra.mxu1 %v765_v11  ;;  %v381_v11 = vld [vmem:[#allocation10 + $0x68] sm:$0xff] }
  0x65   :  { %352 = vmatpush.msra.mxu1 %v770_v13  ;;  %v379_v13 = vld [vmem:[#allocation10 + $0x58] sm:$0xff] }
  0x67   :  { %353 = vmatpush.msra.mxu1 %v775_v15  ;;  %v377_v15 = vld [vmem:[#allocation10 + $0x48] sm:$0xff] }
  0x69   :  { %354 = vmatpush.msra.mxu1 %v780_v17  ;;  %v376_v17 = vld [vmem:[#allocation10 + $0x40] sm:$0xff] }
  0x6a   :  { %159 = vmatmul.f32.gmra.mxu0 %v109_v47 }
  0x6b   :  { %355 = vmatpush.msra.mxu1 %v785_v19  ;;  %v374_v19 = vld [vmem:[#allocation10 + $0x30] sm:$0xff] }
  0x6d   :  { %356 = vmatpush.msra.mxu1 %v790_v21 }
  0x6f   :  { %357 = vmatpush.msra.mxu1 %v795_v23 }
  0x71   :  { %358 = vmatpush.msra.mxu1 %v800_v25  ;;  %v372_v25 = vld [vmem:[#allocation10 + $0x20] sm:$0xff] }
  0x72   :  { %162 = vmatmul.f32.gmra.mxu0 %v110_v53 }
  0x73   :  { %359 = vmatpush.msra.mxu1 %v805_v27  ;;  %v370_v27 = vld [vmem:[#allocation10 + $0x10] sm:$0xff] }
  0x75   :  { %360 = vmatpush.msra.mxu1 %v810_v29  ;;  %v368_v29 = vld [vmem:[#allocation10] sm:$0xff] }
  0x77   :  { %361 = vmatpush.msra.mxu1 %v815_v31 }
  0x7a   :  { %165 = vmatmul.f32.gmra.mxu0 %v111_v59 }
  0x82   :  { %168 = vmatmul.f32.gmra.mxu0 %v112_v60 }
  0x8a   :  { %171 = vmatmul.f32.gmra.mxu0 %v113_v2 }
  0xb4   :  { %v151_v36 = vpop.f32.mrf.mxu0 }
  0xb5   :  { %v209_v37 = vpop.f32.mrf.mxu1  ;;  %v152_v38 = vadd.f32 %v908_v35, %v151_v36 }
  0xb7   :  { %v212_v39 = vadd.f32 %v209_v37, %v152_v38 }
  0xb9   :  { %478 = vtanh.f32 %v212_v39 }
  0xbf   :  { %v479_v40 = vpop.eup %478 }
  0xc0   :  { %230 = vmatmul.f32.vlgmr.msra.gmra.mxu2 %v479_v40 }
  0xc1   :  { %388 = vmatpush.msra.mxu2 %v383_v8 }
  0xc3   :  { %389 = vmatpush.msra.mxu2 %v382_v9 }
  0xc5   :  { %390 = vmatpush.msra.mxu2 %v381_v11 }
  0xc7   :  { %391 = vmatpush.msra.mxu2 %v380_v12 }
  0xc9   :  { %392 = vmatpush.msra.mxu2 %v379_v13 }
  0xcb   :  { %393 = vmatpush.msra.mxu2 %v378_v14 }
  0xcd   :  { %394 = vmatpush.msra.mxu2 %v377_v15 }
  0xcf   :  { %395 = vmatpush.msra.mxu2 %v376_v17 }
  0xd1   :  { %396 = vmatpush.msra.mxu2 %v375_v18 }
  0xd3   :  { %397 = vmatpush.msra.mxu2 %v374_v19 }
  0xd5   :  { %398 = vmatpush.msra.mxu2 %v373_v20 }
  0xd7   :  { %v154_v42 = vpop.f32.mrf.mxu0  ;;  %399 = vmatpush.msra.mxu2 %v372_v25 }
  0xd8   :  { %v155_v43 = vadd.f32 %v908_v35, %v154_v42 }
  0xd9   :  { %400 = vmatpush.msra.mxu2 %v371_v26 }
  0xdb   :  { %401 = vmatpush.msra.mxu2 %v370_v27 }
  0xdd   :  { %402 = vmatpush.msra.mxu2 %v369_v28 }
  0xdf   :  { %v157_v48 = vpop.f32.mrf.mxu0  ;;  %403 = vmatpush.msra.mxu2 %v368_v29 }
  0xe0   :  { %v158_v49 = vadd.f32 %v908_v35, %v157_v48 }
  0xe7   :  { %v160_v54 = vpop.f32.mrf.mxu0 }
  0xe8   :  { %v161_v55 = vadd.f32 %v908_v35, %v160_v54 }
  0xef   :  { %v163_v61 = vpop.f32.mrf.mxu0 }
  0xf0   :  { %v164_v62 = vadd.f32 %v908_v35, %v163_v61 }
  0xf7   :  { %v166_v3 = vpop.f32.mrf.mxu0 }
  0xf8   :  { %v167_v4 = vadd.f32 %v908_v35, %v166_v3 }
  0xff   :  { %v169_v10 = vpop.f32.mrf.mxu0 }
 0x100   :  { %v170_v21 = vadd.f32 %v908_v35, %v169_v10 }
 0x107   :  { %v172_v16 = vpop.f32.mrf.mxu0 }
 0x108   :  { %v173_v30 = vadd.f32 %v908_v35, %v172_v16 }
 0x143   :  { %v231_v44 = vpop.f32.mrf.mxu2 }
 0x144   :  { %v234_v45 = vadd.f32 %v231_v44, %v155_v43 }
 0x146   :  { %480 = vtanh.f32 %v234_v45 }
 0x14c   :  { %v481_v46 = vpop.eup %480 }
 0x14d   :  { %252 = vmatmul.f32.vlgmr.msra.gmra.mxu3 %v481_v46 }
 0x1d0   :  { %v253_v50 = vpop.f32.mrf.mxu3 }
 0x1d1   :  { %v256_v51 = vadd.f32 %v253_v50, %v158_v49 }
 0x1d3   :  { %482 = vtanh.f32 %v256_v51 }
 0x1d9   :  { %v483_v52 = vpop.eup %482 }
 0x1da   :  { %274 = vmatmul.f32.vlgmr.msrb.gmra.mxu1 %v483_v52 }
 0x257   :  { %v275_v56 = vpop.f32.mrf.mxu1 }
 0x258   :  { %v278_v57 = vadd.f32 %v275_v56, %v161_v55 }
 0x25a   :  { %484 = vtanh.f32 %v278_v57 }
 0x260   :  { %v485_v58 = vpop.eup %484 }
 0x261   :  { %296 = vmatmul.f32.vlgmr.msrb.gmra.mxu2 %v485_v58 }
 0x2e4   :  { %v297_v63 = vpop.f32.mrf.mxu2 }
 0x2e5   :  { %v300_v0 = vadd.f32 %v297_v63, %v164_v62 }
 0x2e7   :  { %486 = vtanh.f32 %v300_v0 }
 0x2ed   :  { %v487_v1 = vpop.eup %486 }
 0x2ee   :  { %318 = vmatmul.f32.vlgmr.msrb.gmra.mxu3 %v487_v1 }
 0x371   :  { %v319_v5 = vpop.f32.mrf.mxu3 }
 0x372   :  { %v322_v6 = vadd.f32 %v319_v5, %v167_v4 }
 0x374   :  { %488 = vtanh.f32 %v322_v6 }
 0x37a   :  { %v489_v7 = vpop.eup %488 }
 0x37b   :  { %340 = vmatmul.f32.vlgmr.msrb.gmra.mxu0 %v489_v7 }
 0x3f8   :  { %v341_v22 = vpop.f32.mrf.mxu0 }
 0x3f9   :  { %v344_v23 = vadd.f32 %v341_v22, %v170_v21 }
 0x3fb   :  { %490 = vtanh.f32 %v344_v23 }
 0x401   :  { %v491_v24 = vpop.eup %490 }
 0x402   :  { %362 = vmatmul.f32.vlgmr.msra.gmra.mxu1 %v491_v24 }
 0x47f   :  { %v363_v31 = vpop.f32.mrf.mxu1 }
 0x480   :  { %v366_v32 = vadd.f32 %v363_v31, %v173_v30 }
 0x482   :  { %492 = vtanh.f32 %v366_v32 }
 0x488   :  { %v493_v33 = vpop.eup %492 }
 0x489   :  { %431 = vst [vmem:[#allocation12] sm:$0xff] %v493_v33  ;;  %404 = vmatmul.f32.vlgmr.msra.gmra.mxu2 %v493_v33 }
 0x48a   :  { %453 = dma.vmem_to_hbm [thread:$0]  %s449_s9, 128, %s451_s12, [#allocation13]  }
 0x50c   :  { %v405_v36 = vpop.f32.mrf.mxu2 }
 0x50d   :  { %v406_v37 = vadd.f32 %v477_v34, %v405_v36 }
 0x50f   :  { %408 = vmax.xlane.f32.xlu0 %v406_v37 }
 0x582   :  { %v409_v38 = vpop.xlane.xlu0 %408 }
 0x583   :  { %v410_v39 = vsub.f32 %v406_v37, %v409_v38 }
 0x585   :  { %v411_v40 = vmul.f32 1.442695, %v410_v39 }
 0x587   :  { %494 = vpow2.f32 %v411_v40 }
 0x58d   :  { %v495_v41 = vpop.eup %494 }
 0x58e   :  { %413 = vadd.xlane.f32.xlu0 %v495_v41 }
 0x601   :  { %v414_v35 = vpop.xlane.xlu0 %413 }
 0x602   :  { %496 = vrcp.f32 %v414_v35  ;;  %v426_v45 = vand.u32 2147483648, %v414_v35  ;;  %v424_v47 = vand.u32 2147483647, %v414_v35  ;;  %vm420_vm1 = vweird.f32 %v414_v35 }
 0x604   :  { %v427_v49 = vor.u32 1.1754944e-38, %v426_v45  ;;  %vm425_vm3 = vcmp.eq.f32.partialorder %v424_v47, 8.507059e+37 }
 0x608   :  { %v497_v42 = vpop.eup %496 }
 0x609   :  { %v416_v43 = vmul.f32 %v497_v42, %v414_v35  ;;  %vm421_vm0 = vweird.f32 %v497_v42 }
 0x60a   :  { %vm422_vm2 = vmor %vm420_vm1, %vm421_vm0 }
 0x60b   :  { %v417_v44 = vsub.f32 1.0, %v416_v43 }
 0x60d   :  { %v418_v46 = vmul.f32 %v497_v42, %v417_v44 }
 0x60f   :  { %v419_v48 = vadd.f32 %v497_v42, %v418_v46 }
 0x611   :  { %v423_v50 = vsel %vm422_vm2, %v497_v42, %v419_v48 }
 0x612   :  { %v428_v51 = vsel %vm425_vm3, %v427_v49, %v423_v50 }
 0x613   :  { %v429_v52 = vmul.f32 %v495_v41, %v428_v51 }
 0x615   :  { %430 = vst [vmem:[#allocation11] sm:$0xff] %v429_v52 }
 0x616   :  { %442 = dma.vmem_to_hbm [thread:$0]  %s438_s13, 128, %s440_s15, [#allocation4]  }
 0x617   :  { %672 = dma.done.wait [#allocation4], 128  }
 0x618   :  { %673 = vsyncadd [#allocation4], 4294967168 }
 0x619   :  { %674 = dma.done.wait [#allocation13], 128  }
 0x61a   :  { %675 = vsyncadd [#allocation13], 4294967168 }
 0x61b   :  { %462 = vsyncpa [#allocation3], 1 }
 0x61c   :  { %463 = vsyncpa [#allocation6], 1 }
 0x61d   :  { %464 = vsyncpa [#allocation9], 1 }
 0x61e   :  { %465 = vsyncpa [#allocation4], 1 }
 0x61f   :  { %466 = vsyncpa [#allocation13], 1 }

</bundles_post_ra>
